<compile_context>
chip_gen: v7x
topology: tpu7x:2x2x1
jax: 0.10.0
libtpu: 0.0.40
codegen_flags: <defaults>
</compile_context>

<pallas_src>
import jax
import jax.numpy as jnp
import numpy as np
from jax.experimental import pallas as pl
from jax.experimental.pallas import tpu as pltpu


# ----------------------------------------------------------------------------
# Kernel
# ----------------------------------------------------------------------------
def _tfar_kernel(offs_ref,                                  # SMEM: (n_t,) band offsets
                 m_ref, n_ref, maskm_ref, gn_ref,
                 w2_ref, b2_ref, w1_ref, b1_ref, w3_ref, b3_ref,
                 o_ref, t13_s):
    """One (batch, output-time-tile) grid step.

    m_ref    : (C, tT + 2K - 2)  overlapped m slab for this tile (channel-major)
    n_ref    : (Tn_p, C)         full A_G for this batch element (time-major, resident)
    maskm_ref: (K, tT)           m-branch shift-select masks for this tile (0/1)
    gn_ref   : (band, tT)        banded one-hot nearest-upsample for this tile (bf16)
    w2/b2    : (C, K) / (C, 1)   BN-folded m-branch taps / bias (channel-major)
    w1,b1,w3,b3 : (K, C)/(1, C)  BN-folded n-branch taps / bias (time-major)
    o_ref    : (C, tT)           output tile (lane-dense)
    t13_s    : (Lp, 2C)          per-batch scratch: [sigmoid(t1) | t3] conv outputs
    """
    C, tT = o_ref.shape
    K = w2_ref.shape[1]
    Lp = t13_s.shape[0]
    band = gn_ref.shape[0]
    t = pl.program_id(1)

    # ---- per-batch init: n-branch convs + BN affine (+ sigmoid), hoisted ----
    @pl.when(t == 0)
    def _init():
        nT = n_ref[...].astype(jnp.float32)                 # (Tn_p, C)
        w1 = w1_ref[...].astype(jnp.float32)                # (K, C)
        w3 = w3_ref[...].astype(jnp.float32)
        t1 = w1[0:1, :] * nT[0:Lp, :]
        t3 = w3[0:1, :] * nT[0:Lp, :]
        for k in range(1, K):                               # K tiny & static
            t1 = t1 + w1[k:k + 1, :] * nT[k:k + Lp, :]
            t3 = t3 + w3[k:k + 1, :] * nT[k:k + Lp, :]
        t1 = t1 + b1_ref[...].astype(jnp.float32)
        t1 = pl.reciprocal(1.0 + jnp.exp(-t1), approx=False)    # sigmoid (EUP)
        t3 = t3 + b3_ref[...].astype(jnp.float32)
        t13_s[:, 0:C] = t1                                  # stacked along lanes
        t13_s[:, C:2 * C] = t3

    # ---- m branch: depthwise conv over the tile slab + K-way shift-select ---
    mp = m_ref[...].astype(jnp.float32)                     # (C, tT + 2K - 2)
    w2 = w2_ref[...].astype(jnp.float32)                    # (C, K)
    ylen = tT + K - 1
    y = w2[:, 0:1] * mp[:, 0:ylen]
    for k in range(1, K):
        y = y + w2[:, k:k + 1] * mp[:, k:k + ylen]
    y = y + b2_ref[...].astype(jnp.float32)                 # (C, tT + K - 1)
    # nearest Lm->T is a shift by s(j) in [0, K-1]: masked shift-select (VPU).
    t2u = maskm_ref[0:1, :] * y[:, K - 1:K - 1 + tT]
    for d in range(1, K):
        t2u = t2u + maskm_ref[d:d + 1, :] * y[:, K - 1 - d:K - 1 - d + tT]

    # ---- n branch: banded one-hot nearest-upsample via a single MXU matmul --
    off = offs_ref[t]                                       # band row offset
    nb = t13_s[pl.ds(off, band), :]                         # (band, 2C)
    g = gn_ref[...].astype(jnp.float32)                     # (band, tT), exact 0/1
    u = jnp.dot(nb.T, g, preferred_element_type=jnp.float32)  # (2C, tT)

    o_ref[...] = (u[0:C, :] * t2u + u[C:2 * C, :]).astype(o_ref.dtype)


# ----------------------------------------------------------------------------
# Wrapper helpers
# ----------------------------------------------------------------------------
def _round_up(x, m):
    return ((x + m - 1) // m) * m


def _fold_bn_into_dwconv(conv_w, gamma, beta, mean, var, eps):
    # BN(conv(x, w)) = conv(x, w*s) + (beta - mean*s),  s = gamma/sqrt(var+eps)
    C = conv_w.shape[0]
    K = conv_w.shape[-1]
    s = gamma / jnp.sqrt(var + eps)
    w_eff = (conv_w.reshape(C, K) * s[:, None]).astype(jnp.float32)
    b_eff = (beta - mean * s).astype(jnp.float32)           # (C,)
    return w_eff, b_eff


def _pick_time_tile(T):
    # Lane-dense output tiles (multiple of 128); per-tile blocks are now small,
    # so just pick the biggest divisor that leaves >1 pipeline step.
    for cand in (512, 256, 128):
        if T > cand and T % cand == 0:
            return cand
    return T


# ----------------------------------------------------------------------------
# Public wrapper
# ----------------------------------------------------------------------------
def tfar_unit_video(m, n, w1_params, w2_params, w3_params, eps=1e-5, time_tile=None):
    """Pallas forward of TFARUnitVideo (inference-mode BatchNorm).

    m : (B, C, T)   -- A_i (downsampled features), T is the interpolation target
    n : (B, C, Tn)  -- A_G (attentioned features)
    w*_params : (conv_weight (C,1,K), bn_gamma, bn_beta, bn_running_mean, bn_running_var)
    """
    B, C, T = m.shape
    Bn, Cn, Tn = n.shape
    assert (Bn, Cn) == (B, C)
    K = int(w1_params[0].shape[-1])
    Lm = T - K + 1
    Ln = Tn - K + 1
    assert Lm >= 1 and Ln >= 1, "time axes must be longer than the conv kernel"

    w1, b1 = _fold_bn_into_dwconv(*w1_params, eps)
    w2, b2 = _fold_bn_into_dwconv(*w2_params, eps)
    w3, b3 = _fold_bn_into_dwconv(*w3_params, eps)

    tT = int(time_tile) if time_tile else _pick_time_tile(T)
    assert T % tT == 0
    n_t = T // tT
    W = tT + 2 * (K - 1)                                    # m slab width per tile

    # Banded n-branch upsample: rows touched per tile, padded to sublanes.
    band = ((tT - 1) * Ln) // T + 2
    band = _round_up(max(band, 8), 8)
    Lp = _round_up(Ln + band, 8)                            # scratch rows (padded)
    Tn_p = Lp + K - 1                                       # padded n length

    # ---- static selection tables (host-side) --------------------------------
    j = np.arange(T, dtype=np.int64)
    # m branch: s(j) = j - (j*Lm)//T = ceil(j*(K-1)/T) in [0, K-1]
    s = (j * (K - 1) + (T - 1)) // T
    maskm = (np.arange(K)[:, None] == s[None, :]).astype(np.float32)      # (K, T)
    maskm_t = np.ascontiguousarray(maskm.reshape(K, n_t, tT).transpose(1, 0, 2))
    # n branch: banded one-hot, rows relative to per-tile offset offs[t]
    src = (j * Ln) // T
    offs = (np.arange(n_t, dtype=np.int64) * tT * Ln) // T                # (n_t,)
    r = src.reshape(n_t, tT) - offs[:, None]                              # (n_t, tT)
    gn_b = (np.arange(band)[None, :, None] == r[:, None, :])              # (n_t, band, tT)
    offs = offs.astype(np.int32)

    # ---- layout plumbing (wrapper-side, outside the kernel) -----------------
    # m: overlapping per-tile slabs (tile + (K-1)-halo on each side), channel-major.
    m_pad = jnp.pad(m.astype(jnp.float32), ((0, 0), (0, 0), (K - 1, K - 1)))
    col = (np.arange(n_t)[:, None] * tT + np.arange(W)[None, :]).astype(np.int32)
    m_ov = jnp.transpose(m_pad[:, :, col], (0, 2, 1, 3))                  # (B, n_t, C, W)
    # n: time-major, zero-padded so the in-kernel conv yields exactly Lp rows.
    n_T = jnp.transpose(n.astype(jnp.float32), (0, 2, 1))                 # (B, Tn, C)
    n_T = jnp.pad(n_T, ((0, 0), (0, Tn_p - Tn), (0, 0)))                  # (B, Tn_p, C)

    w2c = w2                                                              # (C, K)
    b2c = b2.reshape(C, 1)
    w1t = jnp.transpose(w1)                                               # (K, C)
    b1t = b1.reshape(1, C)
    w3t = jnp.transpose(w3)
    b3t = b3.reshape(1, C)

    # ---- VMEM budget & cost estimate ----------------------------------------
    out_itemsize = jnp.dtype(m.dtype).itemsize
    blk_bytes = 2 * (C * W * 4 + Tn_p * C * 4 + K * tT * 4 + band * tT * 2
                     + (C * K + C + 2 * (K * C + C)) * 4
                     + C * tT * out_itemsize)
    scratch_bytes = Lp * 2 * C * 4
    vmem_limit = min(64 * 1024 * 1024,
                     max(8 * 1024 * 1024,
                         int(1.5 * (blk_bytes + scratch_bytes)) + (1 << 20)))

    flops = int(B * (4 * K * C * T            # m-branch conv + shift-select
                     + 4 * K * C * Lp         # n-branch convs (once per batch)
                     + 4 * C * band * T       # banded upsample matmul (2C x band x tT x n_t)
                     + 3 * C * T))            # t1u*t2u + t3u
    transcendentals = int(B * C * Lp)
    bytes_accessed = int(B * (C * n_t * W * 4 + Tn_p * C * 4 + K * T * 4
                              + band * T * 2 + C * T * out_itemsize))

    grid_spec = pltpu.PrefetchScalarGridSpec(
        num_scalar_prefetch=1,
        grid=(B, n_t),
        in_specs=[
            # m slabs: one per (b, t)
            pl.BlockSpec((None, None, C, W), lambda b, t, so: (b, t, 0, 0)),
            # n: full, resident per batch element
            pl.BlockSpec((None, Tn_p, C), lambda b, t, so: (b, 0, 0)),
            # per-tile shift masks and banded one-hot
            pl.BlockSpec((None, K, tT), lambda b, t, so: (t, 0, 0)),
            pl.BlockSpec((None, band, tT), lambda b, t, so: (t, 0, 0)),
            # folded params: constant block index -> resident across the grid
            pl.BlockSpec((C, K), lambda b, t, so: (0, 0)),
            pl.BlockSpec((C, 1), lambda b, t, so: (0, 0)),
            pl.BlockSpec((K, C), lambda b, t, so: (0, 0)),
            pl.BlockSpec((1, C), lambda b, t, so: (0, 0)),
            pl.BlockSpec((K, C), lambda b, t, so: (0, 0)),
            pl.BlockSpec((1, C), lambda b, t, so: (0, 0)),
        ],
        out_specs=pl.BlockSpec((None, C, tT), lambda b, t, so: (b, 0, t)),
        scratch_shapes=[pltpu.VMEM((Lp, 2 * C), jnp.float32)],
    )

    return pl.pallas_call(
        _tfar_kernel,
        out_shape=jax.ShapeDtypeStruct((B, C, T), m.dtype),
        grid_spec=grid_spec,
        compiler_params=pltpu.CompilerParams(
            dimension_semantics=("parallel", "arbitrary"),
            vmem_limit_bytes=vmem_limit,
        ),
        cost_estimate=pl.CostEstimate(
            flops=flops,
            transcendentals=transcendentals,
            bytes_accessed=bytes_accessed,
        ),
    )(jnp.asarray(offs),
      m_ov, n_T,
      jnp.asarray(maskm_t), jnp.asarray(gn_b, dtype=jnp.bfloat16),
      w2c, b2c, w1t, b1t, w3t, b3t)


# ----------------------------------------------------------------------------
# Pure-JAX reference (mirrors the PyTorch forward, inference-mode BN)
# ----------------------------------------------------------------------------
def tfar_unit_video_ref(m, n, w1_params, w2_params, w3_params, eps=1e-5):
    B, C, T = m.shape

    def branch(x, conv_w, gamma, beta, mean, var, sigmoid=False):
        K = conv_w.shape[-1]
        L = x.shape[-1] - K + 1
        w = conv_w.reshape(C, K)
        y = jnp.zeros((B, C, L), jnp.float32)
        for j in range(K):                                  # depthwise 'valid' conv
            y = y + w[None, :, j:j + 1] * x[..., j:j + L]
        y = (y - mean[None, :, None]) / jnp.sqrt(var + eps)[None, :, None]
        y = y * gamma[None, :, None] + beta[None, :, None]
        if sigmoid:
            y = 1.0 / (1.0 + jnp.exp(-y))
        idx = (jnp.arange(T) * L) // T                      # nearest upsample to T
        return y[..., idx]

    t1 = branch(n, *w1_params, sigmoid=True)
    t3 = branch(n, *w3_params)
    t2 = branch(m, *w2_params)
    return (t1 * t2 + t3).astype(m.dtype)


# ----------------------------------------------------------------------------
# Self-test
# ----------------------------------------------------------------------------
if __name__ == "__main__":
    key = jax.random.PRNGKey(0)
    ks = jax.random.split(key, 17)

    # Small but representative: depthwise conv requires out_channels == in_channels.
    B, C, K = 2, 8, 3
    Tm, Tn = 256, 64                 # n (A_G) is temporally downsampled vs m (A_i)

    m = jax.random.normal(ks[0], (B, C, Tm), dtype=jnp.float32)
    n = jax.random.normal(ks[1], (B, C, Tn), dtype=jnp.float32)

    def make_branch_params(k_w, k_g, k_b, k_m, k_v):
        conv_w = 0.5 * jax.random.normal(k_w, (C, 1, K), jnp.float32)   # torch (Cout, Cin/groups, K)
        gamma = 1.0 + 0.1 * jax.random.normal(k_g, (C,), jnp.float32)
        beta = 0.1 * jax.random.normal(k_b, (C,), jnp.float32)
        mean = 0.1 * jax.random.normal(k_m, (C,), jnp.float32)
        var = 0.5 + jnp.abs(jax.random.normal(k_v, (C,), jnp.float32))
        return conv_w, gamma, beta, mean, var

    w1_params = make_branch_params(*ks[2:7])
    w2_params = make_branch_params(*ks[7:12])
    w3_params = make_branch_params(*ks[12:17])

    out = tfar_unit_video(m, n, w1_params, w2_params, w3_params)
    out = jax.block_until_ready(out)

    ref = tfar_unit_video_ref(m, n, w1_params, w2_params, w3_params)
    assert out.shape == (B, C, Tm)
    # With a full-f32 MXU matmul the error is ~1e-6.  The tolerance is relaxed
    # deliberately (per review) to stay robust if a compiler/generation lowers
    # the f32 x (exact 0/1) selection matmul through bf16 passes.
    assert jnp.allclose(out, ref, atol=2e-2, rtol=2e-2), "mismatch vs reference"

    print("KERNEL_OK")
</pallas_src>

<mosaic_0001>
module attributes {stable_mosaic.version = 11 : i64} {
  func.func @_tfar_kernel(%arg0: i32, %arg1: i32, %arg2: memref<2xi32, #tpu.memory_space<smem>>, %arg3: memref<1x1x8x132xf32, #tpu.memory_space<vmem>>, %arg4: memref<1x98x8xf32, #tpu.memory_space<vmem>>, %arg5: memref<1x3x128xf32, #tpu.memory_space<vmem>>, %arg6: memref<1x32x128xbf16, #tpu.memory_space<vmem>>, %arg7: memref<8x3xf32, #tpu.memory_space<vmem>>, %arg8: memref<8x1xf32, #tpu.memory_space<vmem>>, %arg9: memref<3x8xf32, #tpu.memory_space<vmem>>, %arg10: memref<1x8xf32, #tpu.memory_space<vmem>>, %arg11: memref<3x8xf32, #tpu.memory_space<vmem>>, %arg12: memref<1x8xf32, #tpu.memory_space<vmem>>, %arg13: memref<1x8x128xf32, #tpu.memory_space<vmem>>, %arg14: memref<96x16xf32, #tpu.memory_space<vmem>>) attributes {dimension_semantics = [#tpu.dimension_semantics<parallel>, #tpu.dimension_semantics<arbitrary>], iteration_bounds = array<i64: 2, 2>, scalar_prefetch = 1 : i64, scratch_operands = 1 : i64, tpu.core_type = #tpu.core_type<tc>, window_params = [{transform_indices = @transform_0, window_bounds = array<i64: 1, 1, 8, 132>}, {transform_indices = @transform_1, window_bounds = array<i64: 1, 98, 8>}, {transform_indices = @transform_2, window_bounds = array<i64: 1, 3, 128>}, {transform_indices = @transform_3, window_bounds = array<i64: 1, 32, 128>}, {pipeline_mode = #tpu.pipeline_mode<synchronous>, transform_indices = @transform_4, window_bounds = array<i64: 8, 3>}, {pipeline_mode = #tpu.pipeline_mode<synchronous>, transform_indices = @transform_5, window_bounds = array<i64: 8, 1>}, {pipeline_mode = #tpu.pipeline_mode<synchronous>, transform_indices = @transform_6, window_bounds = array<i64: 3, 8>}, {pipeline_mode = #tpu.pipeline_mode<synchronous>, transform_indices = @transform_7, window_bounds = array<i64: 1, 8>}, {pipeline_mode = #tpu.pipeline_mode<synchronous>, transform_indices = @transform_8, window_bounds = array<i64: 3, 8>}, {pipeline_mode = #tpu.pipeline_mode<synchronous>, transform_indices = @transform_9, window_bounds = array<i64: 1, 8>}, {transform_indices = @transform_10, window_bounds = array<i64: 1, 8, 128>}]} {
    %c0_i32 = arith.constant 0 : i32
    %0 = arith.cmpi eq, %arg1, %c0_i32 : i32
    %1 = arith.extui %0 : i1 to i32
    %c0_i32_0 = arith.constant 0 : i32
    %2 = arith.cmpi ne, %1, %c0_i32_0 : i32
    scf.if %2 {
      %c0_22 = arith.constant 0 : index
      %c0_23 = arith.constant 0 : index
      %c0_24 = arith.constant 0 : index
      %56 = vector.load %arg4[%c0_22, %c0_23, %c0_24] : memref<1x98x8xf32, #tpu.memory_space<vmem>>, vector<1x98x8xf32>
      %57 = vector.shape_cast %56 : vector<1x98x8xf32> to vector<98x8xf32>
      %c0_25 = arith.constant 0 : index
      %c0_26 = arith.constant 0 : index
      %58 = vector.load %arg9[%c0_25, %c0_26] : memref<3x8xf32, #tpu.memory_space<vmem>>, vector<3x8xf32>
      %c0_27 = arith.constant 0 : index
      %c0_28 = arith.constant 0 : index
      %59 = vector.load %arg11[%c0_27, %c0_28] : memref<3x8xf32, #tpu.memory_space<vmem>>, vector<3x8xf32>
      %60 = vector.extract_strided_slice %58 {offsets = [0, 0], sizes = [1, 8], strides = [1, 1]} : vector<3x8xf32> to vector<1x8xf32>
      %61 = vector.extract_strided_slice %57 {offsets = [0, 0], sizes = [96, 8], strides = [1, 1]} : vector<98x8xf32> to vector<96x8xf32>
      %62 = vector.broadcast %60 : vector<1x8xf32> to vector<96x8xf32>
      %63 = arith.mulf %62, %61 : vector<96x8xf32>
      %64 = vector.extract_strided_slice %59 {offsets = [0, 0], sizes = [1, 8], strides = [1, 1]} : vector<3x8xf32> to vector<1x8xf32>
      %65 = vector.extract_strided_slice %57 {offsets = [0, 0], sizes = [96, 8], strides = [1, 1]} : vector<98x8xf32> to vector<96x8xf32>
      %66 = vector.broadcast %64 : vector<1x8xf32> to vector<96x8xf32>
      %67 = arith.mulf %66, %65 : vector<96x8xf32>
      %68 = vector.extract_strided_slice %58 {offsets = [1, 0], sizes = [1, 8], strides = [1, 1]} : vector<3x8xf32> to vector<1x8xf32>
      %69 = vector.extract_strided_slice %57 {offsets = [1, 0], sizes = [96, 8], strides = [1, 1]} : vector<98x8xf32> to vector<96x8xf32>
      %70 = vector.broadcast %68 : vector<1x8xf32> to vector<96x8xf32>
      %71 = arith.mulf %70, %69 : vector<96x8xf32>
      %72 = arith.addf %63, %71 : vector<96x8xf32>
      %73 = vector.extract_strided_slice %59 {offsets = [1, 0], sizes = [1, 8], strides = [1, 1]} : vector<3x8xf32> to vector<1x8xf32>
      %74 = vector.extract_strided_slice %57 {offsets = [1, 0], sizes = [96, 8], strides = [1, 1]} : vector<98x8xf32> to vector<96x8xf32>
      %75 = vector.broadcast %73 : vector<1x8xf32> to vector<96x8xf32>
      %76 = arith.mulf %75, %74 : vector<96x8xf32>
      %77 = arith.addf %67, %76 : vector<96x8xf32>
      %78 = vector.extract_strided_slice %58 {offsets = [2, 0], sizes = [1, 8], strides = [1, 1]} : vector<3x8xf32> to vector<1x8xf32>
      %79 = vector.extract_strided_slice %57 {offsets = [2, 0], sizes = [96, 8], strides = [1, 1]} : vector<98x8xf32> to vector<96x8xf32>
      %80 = vector.broadcast %78 : vector<1x8xf32> to vector<96x8xf32>
      %81 = arith.mulf %80, %79 : vector<96x8xf32>
      %82 = arith.addf %72, %81 : vector<96x8xf32>
      %83 = vector.extract_strided_slice %59 {offsets = [2, 0], sizes = [1, 8], strides = [1, 1]} : vector<3x8xf32> to vector<1x8xf32>
      %84 = vector.extract_strided_slice %57 {offsets = [2, 0], sizes = [96, 8], strides = [1, 1]} : vector<98x8xf32> to vector<96x8xf32>
      %85 = vector.broadcast %83 : vector<1x8xf32> to vector<96x8xf32>
      %86 = arith.mulf %85, %84 : vector<96x8xf32>
      %87 = arith.addf %77, %86 : vector<96x8xf32>
      %c0_29 = arith.constant 0 : index
      %c0_30 = arith.constant 0 : index
      %88 = vector.load %arg10[%c0_29, %c0_30] : memref<1x8xf32, #tpu.memory_space<vmem>>, vector<1x8xf32>
      %89 = vector.broadcast %88 : vector<1x8xf32> to vector<96x8xf32>
      %90 = arith.addf %82, %89 : vector<96x8xf32>
      %cst_31 = arith.constant 0.000000e+00 : f32
      %91 = vector.broadcast %cst_31 : f32 to vector<96x8xf32>
      %92 = arith.subf %91, %90 : vector<96x8xf32>
      %93 = math.exp %92 : vector<96x8xf32>
      %cst_32 = arith.constant 1.000000e+00 : f32
      %94 = vector.broadcast %cst_32 : f32 to vector<96x8xf32>
      %95 = arith.addf %94, %93 : vector<96x8xf32>
      %96 = tpu.reciprocal %95 : vector<96x8xf32> -> vector<96x8xf32>
      %c0_33 = arith.constant 0 : index
      %c0_34 = arith.constant 0 : index
      %97 = vector.load %arg12[%c0_33, %c0_34] : memref<1x8xf32, #tpu.memory_space<vmem>>, vector<1x8xf32>
      %98 = vector.broadcast %97 : vector<1x8xf32> to vector<96x8xf32>
      %99 = arith.addf %87, %98 : vector<96x8xf32>
      %c0_35 = arith.constant 0 : index
      %c0_36 = arith.constant 0 : index
      %100 = vector.load %arg14[%c0_35, %c0_36] : memref<96x16xf32, #tpu.memory_space<vmem>>, vector<96x8xf32>
      tpu.vector_store %arg14[%c0_35, %c0_36], %96 {strides = array<i32>} : memref<96x16xf32, #tpu.memory_space<vmem>>, vector<96x8xf32>,
      %c0_37 = arith.constant 0 : index
      %c8 = arith.constant 8 : index
      %101 = vector.load %arg14[%c0_37, %c8] : memref<96x16xf32, #tpu.memory_space<vmem>>, vector<96x8xf32>
      tpu.vector_store %arg14[%c0_37, %c8], %99 {strides = array<i32>} : memref<96x16xf32, #tpu.memory_space<vmem>>, vector<96x8xf32>,
    } else {
    }
    %c0 = arith.constant 0 : index
    %c0_1 = arith.constant 0 : index
    %c0_2 = arith.constant 0 : index
    %c0_3 = arith.constant 0 : index
    %3 = vector.load %arg3[%c0, %c0_1, %c0_2, %c0_3] : memref<1x1x8x132xf32, #tpu.memory_space<vmem>>, vector<1x1x8x132xf32>
    %4 = vector.shape_cast %3 : vector<1x1x8x132xf32> to vector<8x132xf32>
    %c0_4 = arith.constant 0 : index
    %c0_5 = arith.constant 0 : index
    %5 = vector.load %arg7[%c0_4, %c0_5] : memref<8x3xf32, #tpu.memory_space<vmem>>, vector<8x3xf32>
    %6 = vector.extract_strided_slice %5 {offsets = [0, 0], sizes = [8, 1], strides = [1, 1]} : vector<8x3xf32> to vector<8x1xf32>
    %7 = vector.extract_strided_slice %4 {offsets = [0, 0], sizes = [8, 130], strides = [1, 1]} : vector<8x132xf32> to vector<8x130xf32>
    %8 = vector.broadcast %6 : vector<8x1xf32> to vector<8x130xf32>
    %9 = arith.mulf %8, %7 : vector<8x130xf32>
    %10 = vector.extract_strided_slice %5 {offsets = [0, 1], sizes = [8, 1], strides = [1, 1]} : vector<8x3xf32> to vector<8x1xf32>
    %11 = vector.extract_strided_slice %4 {offsets = [0, 1], sizes = [8, 130], strides = [1, 1]} : vector<8x132xf32> to vector<8x130xf32>
    %12 = vector.broadcast %10 : vector<8x1xf32> to vector<8x130xf32>
    %13 = arith.mulf %12, %11 : vector<8x130xf32>
    %14 = arith.addf %9, %13 : vector<8x130xf32>
    %15 = vector.extract_strided_slice %5 {offsets = [0, 2], sizes = [8, 1], strides = [1, 1]} : vector<8x3xf32> to vector<8x1xf32>
    %16 = vector.extract_strided_slice %4 {offsets = [0, 2], sizes = [8, 130], strides = [1, 1]} : vector<8x132xf32> to vector<8x130xf32>
    %17 = vector.broadcast %15 : vector<8x1xf32> to vector<8x130xf32>
    %18 = arith.mulf %17, %16 : vector<8x130xf32>
    %19 = arith.addf %14, %18 : vector<8x130xf32>
    %c0_6 = arith.constant 0 : index
    %c0_7 = arith.constant 0 : index
    %20 = vector.load %arg8[%c0_6, %c0_7] : memref<8x1xf32, #tpu.memory_space<vmem>>, vector<8x1xf32>
    %21 = vector.broadcast %20 : vector<8x1xf32> to vector<8x130xf32>
    %22 = arith.addf %19, %21 : vector<8x130xf32>
    %c0_8 = arith.constant 0 : index
    %c0_9 = arith.constant 0 : index
    %c0_10 = arith.constant 0 : index
    %23 = vector.load %arg5[%c0_8, %c0_9, %c0_10] : memref<1x3x128xf32, #tpu.memory_space<vmem>>, vector<1x1x128xf32>
    %24 = vector.shape_cast %23 : vector<1x1x128xf32> to vector<1x128xf32>
    %25 = vector.extract_strided_slice %22 {offsets = [0, 2], sizes = [8, 128], strides = [1, 1]} : vector<8x130xf32> to vector<8x128xf32>
    %26 = vector.broadcast %24 : vector<1x128xf32> to vector<8x128xf32>
    %27 = arith.mulf %26, %25 : vector<8x128xf32>
    %c0_11 = arith.constant 0 : index
    %c1 = arith.constant 1 : index
    %c0_12 = arith.constant 0 : index
    %28 = vector.load %arg5[%c0_11, %c1, %c0_12] : memref<1x3x128xf32, #tpu.memory_space<vmem>>, vector<1x1x128xf32>
    %29 = vector.shape_cast %28 : vector<1x1x128xf32> to vector<1x128xf32>
    %30 = vector.extract_strided_slice %22 {offsets = [0, 1], sizes = [8, 128], strides = [1, 1]} : vector<8x130xf32> to vector<8x128xf32>
    %31 = vector.broadcast %29 : vector<1x128xf32> to vector<8x128xf32>
    %32 = arith.mulf %31, %30 : vector<8x128xf32>
    %33 = arith.addf %27, %32 : vector<8x128xf32>
    %c0_13 = arith.constant 0 : index
    %c2 = arith.constant 2 : index
    %c0_14 = arith.constant 0 : index
    %34 = vector.load %arg5[%c0_13, %c2, %c0_14] : memref<1x3x128xf32, #tpu.memory_space<vmem>>, vector<1x1x128xf32>
    %35 = vector.shape_cast %34 : vector<1x1x128xf32> to vector<1x128xf32>
    %36 = vector.extract_strided_slice %22 {offsets = [0, 0], sizes = [8, 128], strides = [1, 1]} : vector<8x130xf32> to vector<8x128xf32>
    %37 = vector.broadcast %35 : vector<1x128xf32> to vector<8x128xf32>
    %38 = arith.mulf %37, %36 : vector<8x128xf32>
    %39 = arith.addf %33, %38 : vector<8x128xf32>
    %40 = arith.index_cast %arg1 : i32 to index
    %41 = memref.load %arg2[%40] : memref<2xi32, #tpu.memory_space<smem>>
    %42 = arith.index_cast %41 : i32 to index
    %c0_15 = arith.constant 0 : index
    %43 = vector.load %arg14[%42, %c0_15] : memref<96x16xf32, #tpu.memory_space<vmem>>, vector<32x16xf32>
    %c0_16 = arith.constant 0 : index
    %c0_17 = arith.constant 0 : index
    %c0_18 = arith.constant 0 : index
    %44 = vector.load %arg6[%c0_16, %c0_17, %c0_18] : memref<1x32x128xbf16, #tpu.memory_space<vmem>>, vector<1x32x128xbf16>
    %45 = vector.shape_cast %44 : vector<1x32x128xbf16> to vector<32x128xbf16>
    %46 = arith.extf %45 : vector<32x128xbf16> to vector<32x128xf32>
    %47 = tpu.transpose %43, [1, 0] : vector<32x16xf32> -> vector<16x32xf32>
    %cst = arith.constant dense<0.000000e+00> : vector<16x128xf32>
    %48 = tpu.matmul %47, %46, %cst {dimension_numbers = #tpu.dot_dimension_numbers<[1], [0], [0], [1], [0, 0, 1, 1], [], []>} : vector<16x32xf32>, vector<32x128xf32>, vector<16x128xf32> -> vector<16x128xf32>
    %49 = vector.extract_strided_slice %48 {offsets = [0, 0], sizes = [8, 128], strides = [1, 1]} : vector<16x128xf32> to vector<8x128xf32>
    %50 = arith.mulf %49, %39 : vector<8x128xf32>
    %51 = vector.extract_strided_slice %48 {offsets = [8, 0], sizes = [8, 128], strides = [1, 1]} : vector<16x128xf32> to vector<8x128xf32>
    %52 = arith.addf %50, %51 : vector<8x128xf32>
    %c0_19 = arith.constant 0 : index
    %c0_20 = arith.constant 0 : index
    %c0_21 = arith.constant 0 : index
    %53 = vector.load %arg13[%c0_19, %c0_20, %c0_21] : memref<1x8x128xf32, #tpu.memory_space<vmem>>, vector<1x8x128xf32>
    %54 = vector.shape_cast %53 : vector<1x8x128xf32> to vector<8x128xf32>
    %55 = vector.shape_cast %52 : vector<8x128xf32> to vector<1x8x128xf32>
    tpu.vector_store %arg13[%c0_19, %c0_20, %c0_21], %55 {strides = array<i32>} : memref<1x8x128xf32, #tpu.memory_space<vmem>>, vector<1x8x128xf32>,
    return
  }
  func.func @transform_0(%arg0: i32, %arg1: i32, %arg2: memref<2xi32, #tpu.memory_space<smem>>) -> (i32, i32, i32, i32) {
    %c0_i32 = arith.constant 0 : i32
    %c0_i32_0 = arith.constant 0 : i32
    %c0_i32_1 = arith.constant 0 : i32
    return %arg0, %arg1, %c0_i32, %c0_i32_0 : i32, i32, i32, i32
  }
  func.func @transform_1(%arg0: i32, %arg1: i32, %arg2: memref<2xi32, #tpu.memory_space<smem>>) -> (i32, i32, i32) {
    %c0_i32 = arith.constant 0 : i32
    %c0_i32_0 = arith.constant 0 : i32
    %c0_i32_1 = arith.constant 0 : i32
    return %arg0, %c0_i32, %c0_i32_0 : i32, i32, i32
  }
  func.func @transform_2(%arg0: i32, %arg1: i32, %arg2: memref<2xi32, #tpu.memory_space<smem>>) -> (i32, i32, i32) {
    %c0_i32 = arith.constant 0 : i32
    %c0_i32_0 = arith.constant 0 : i32
    %c0_i32_1 = arith.constant 0 : i32
    return %arg1, %c0_i32, %c0_i32_0 : i32, i32, i32
  }
  func.func @transform_3(%arg0: i32, %arg1: i32, %arg2: memref<2xi32, #tpu.memory_space<smem>>) -> (i32, i32, i32) {
    %c0_i32 = arith.constant 0 : i32
    %c0_i32_0 = arith.constant 0 : i32
    %c0_i32_1 = arith.constant 0 : i32
    return %arg1, %c0_i32, %c0_i32_0 : i32, i32, i32
  }
  func.func @transform_4(%arg0: i32, %arg1: i32, %arg2: memref<2xi32, #tpu.memory_space<smem>>) -> (i32, i32) {
    %c0_i32 = arith.constant 0 : i32
    %c0_i32_0 = arith.constant 0 : i32
    %c0_i32_1 = arith.constant 0 : i32
    return %c0_i32, %c0_i32_0 : i32, i32
  }
  func.func @transform_5(%arg0: i32, %arg1: i32, %arg2: memref<2xi32, #tpu.memory_space<smem>>) -> (i32, i32) {
    %c0_i32 = arith.constant 0 : i32
    %c0_i32_0 = arith.constant 0 : i32
    %c0_i32_1 = arith.constant 0 : i32
    return %c0_i32, %c0_i32_0 : i32, i32
  }
  func.func @transform_6(%arg0: i32, %arg1: i32, %arg2: memref<2xi32, #tpu.memory_space<smem>>) -> (i32, i32) {
    %c0_i32 = arith.constant 0 : i32
    %c0_i32_0 = arith.constant 0 : i32
    %c0_i32_1 = arith.constant 0 : i32
    return %c0_i32, %c0_i32_0 : i32, i32
  }
  func.func @transform_7(%arg0: i32, %arg1: i32, %arg2: memref<2xi32, #tpu.memory_space<smem>>) -> (i32, i32) {
    %c0_i32 = arith.constant 0 : i32
    %c0_i32_0 = arith.constant 0 : i32
    %c0_i32_1 = arith.constant 0 : i32
    return %c0_i32, %c0_i32_0 : i32, i32
  }
  func.func @transform_8(%arg0: i32, %arg1: i32, %arg2: memref<2xi32, #tpu.memory_space<smem>>) -> (i32, i32) {
    %c0_i32 = arith.constant 0 : i32
    %c0_i32_0 = arith.constant 0 : i32
    %c0_i32_1 = arith.constant 0 : i32
    return %c0_i32, %c0_i32_0 : i32, i32
  }
  func.func @transform_9(%arg0: i32, %arg1: i32, %arg2: memref<2xi32, #tpu.memory_space<smem>>) -> (i32, i32) {
    %c0_i32 = arith.constant 0 : i32
    %c0_i32_0 = arith.constant 0 : i32
    %c0_i32_1 = arith.constant 0 : i32
    return %c0_i32, %c0_i32_0 : i32, i32
  }
  func.func @transform_10(%arg0: i32, %arg1: i32, %arg2: memref<2xi32, #tpu.memory_space<smem>>) -> (i32, i32, i32) {
    %c0_i32 = arith.constant 0 : i32
    %c0_i32_0 = arith.constant 0 : i32
    return %arg0, %c0_i32, %arg1 : i32, i32, i32
  }
}

</mosaic_0001>

<bundles_post_ra>
// kernel: tpu_custom_call.1
= control target key start
LH: loop header
LB: loop body
LE: loop exit
PB: predicated region body
PF: predicated region fallthrough
CT: control target
= control target key end

     0   :  { %s2299_s0 = inlined_call_operand.vmem [shape: s32[2], index: 0, kind: input, shape index: {}]   ;;  %s2300_s1 = inlined_call_operand.vmem [shape: f32[2,2,8,132], index: 1, kind: input, shape index: {}]   ;;  %s2301_s2 = inlined_call_operand.vmem [shape: f32[2,98,8], index: 2, kind: input, shape index: {}]   ;;  %s2302_s3 = inlined_call_operand.vmem [shape: f32[2,3,128], index: 3, kind: input, shape index: {}]   ;;  %s2303_s4 = inlined_call_operand.vmem [shape: bf16[2,32,128], index: 4, kind: input, shape index: {}]   ;;  %s2304_s5 = inlined_call_operand.vmem [shape: f32[8,3], index: 5, kind: input, shape index: {}]   ;;  %s2305_s6 = inlined_call_operand.vmem [shape: f32[8,1], index: 6, kind: input, shape index: {}]   ;;  %s2306_s7 = inlined_call_operand.vmem [shape: f32[3,8], index: 7, kind: input, shape index: {}]   ;;  %s2307_s8 = inlined_call_operand.vmem [shape: f32[1,8], index: 8, kind: input, shape index: {}]   ;;  %s2308_s9 = inlined_call_operand.vmem [shape: f32[3,8], index: 9, kind: input, shape index: {}]   ;;  %s2309_s10 = inlined_call_operand.vmem [shape: f32[1,8], index: 10, kind: input, shape index: {}]   ;;  %s2310_s11 = inlined_call_operand.hbm [shape: f32[2,8,256], index: 11, kind: output, shape index: {}]  }
   0x1   :  { %2326 = sst [smem:[#allocation21_spill]] %s2310_s11  ;;  %s16_s19 = sshll.u32 %s2299_s0, 4  ;;  %s17_s19 = int_to_ptr.vmem [resolvable:$true] %s16_s19 }
   0x2   :  { %s1537_s20 = scalar_lea.vmem %s17_s19, 16  ;;  %p1542_p1 = scmp.lt.s32.totalorder %s17_s19, %s17_s19 }
   0x3   :  { %p1538_p0 = scmp.ne.s32.totalorder %s17_s19, %s1537_s20  ;;  %p1543_p2 = scmp.lt.s32.totalorder %s1537_s20, %s1537_s20 }
   0x5   :  { %p1544_p3 = por %p1543_p2, %p1542_p1 }
   0x7   :  { %p1545_p4 = pnand %p1544_p3, %p1538_p0 }
   0x9   :  { %1548 = shalt.err (!%p1545_p4)  }
   0xa   :  { %s1647_s21 = smov [#allocation4]  }
   0xb   :  { %19 = dma.vmem_to_smem %s17_s19, 16, %s1647_s21, [#allocation3] }
   0xc   :  { %1609 = dma.done.wait [#allocation3], 16 }
   0xd   :  { %1610 = vsyncadd [#allocation3], 4294967280 }
   0xe   :  { %21 = sfence }
   0xf   :  { %22 = vsyncpa [#allocation6], 0 }
  0x10   :  { %24 = vsyncpa [#allocation6 + $0x1], 0  ;;  %s1718_s22 = smov 0   ;;  %s1720_s23 = smov 0  }
  0x11   :  { %s1722_s0 = smov 0   ;;  %s1724_s24 = smov 0  }
  0x12   :  { %s1726_s25 = smov 0   ;;  %s1728_s26 = smov 0  }
  0x13   :  { %s1730_s27 = smov 0   ;;  %s1732_s28 = smov 0  }
  0x14 LB: > { %2327 = sst [smem:[#allocation9_spill]] %s1617_s22  ;;  %s1344_s29 = sadd.s32 4294967295, %s1645_s28   ;;  %s1645_s28 = sphi %s1732_s28, %s30_s28   ;;  %s1641_s27 = sphi %s1730_s27, %s2355_s27   ;;  %s1637_s26 = sphi %s1728_s26, %s2354_s26   ;;  %s1633_s25 = sphi %s1726_s25, %s2353_s25   ;;  %s1629_s24 = sphi %s1724_s24, %s2352_s24   ;;  %s1625_s0 = sphi %s1722_s0, %s2351_s0   ;;  %s1621_s23 = sphi %s1720_s23, %s2350_s23   ;;  %s1617_s22 = sphi %s1718_s22, %s2349_s22  }
  0x15   : > { %2328 = sst [smem:[#allocation10_spill]] %s1621_s23  ;;  %s1345_s30 = sadd.s32 4294967294, %s1645_s28  }
  0x16   : > { %2329 = sst [smem:[#allocation11_spill]] %s1625_s0  ;;  %s39_s12 = sadd.s32 1, %s1637_s26 }
  0x17   : > { %2330 = sst [smem:[#allocation12_spill]] %s1633_s25  ;;  %p40_p5 = scmp.ge.s32.totalorder %s39_s12, 2 }
  0x18   : > { %2331 = sst [smem:[#allocation13_spill]] %s1637_s26  ;;  %s42_s13 = sadd.s32 1, %s1641_s27 }
  0x19   : > { %2332 = sst [smem:[#allocation14_spill]] %s1641_s27  ;;  %p293_p6 = scmp.ne.s32.totalorder %s1625_s0, %s1621_s23 }
  0x1a   : > { %2333 = sst [smem:[#allocation15_spill]] %s1645_s28  ;;  %p294_p7 = scmp.eq.s32.totalorder %s1344_s29, 3 }
  0x1b   : > { %s2357_s12 = smov (%p40_p5, %s39_s12), 0  ;;  %s2359_s13 = smov (!%p40_p5, %s42_s13), %s1641_s27 }
  0x1c   : > { %2334 = sst [smem:[#allocation16_spill]] %s2357_s12  ;;  %s279_s14 = ssub.s32 %s1637_s26, %s2357_s12 }
  0x1d   : > { %p1769_p8 = por %p294_p7, %p293_p6  ;;  %p44_p9 = scmp.ge.s32.totalorder %s2359_s13, 2 }
  0x1e   : > { %p299_p10 = scmp.ne.s32.totalorder %s1621_s23, %s1617_s22  ;;  %p300_p11 = scmp.eq.s32.totalorder %s1345_s30, 3 }
  0x1f   : > { %s2335_s15 = scalar_select %p1769_p8, 1, 0 }
  0x20   : > { %p1348_p12 = scmp.ge.s32.totalorder %s1645_s28, 1  ;;  %s2361_s13 = smov (%p44_p9, %s2359_s13), 0 }
  0x21   : > { %2336 = sst [smem:[#allocation17_spill]] %s2335_s15  ;;  %p1778_p13 = por %p300_p11, %p299_p10 }
  0x22   : > { %2337 = sst [smem:[#allocation18_spill]] %s2361_s13  ;;  %p371_p0 = scmp.lt.s32.totalorder %s1645_s28, 5 }
  0x23   : > { %s2338_s16 = scalar_select %p1778_p13, 1, 0 }
  0x24   : > { %s278_s17 = ssub.s32 %s1641_s27, %s2361_s13  ;;  %s283_s18 = sadd.s32 1, %s1625_s0 }
  0x25   : > { %2339 = sst [smem:[#allocation19_spill]] %s2338_s16  ;;  %s280_s19 = sor.u32 %s279_s14, %s278_s17 }
  0x26   : > { %p372_p1 = pnand %p1348_p12, %p371_p0  ;;  %p281_p2 = scmp.eq.s32.totalorder %s280_s19, 0 }
  0x27   : > { %s2318_s21 = sand.u32 (!%p372_p1), 1, %s1621_s23   ;;  %p427_p3 = scmp.lt.s32.totalorder (!%p372_p1), %s1633_s25, 1 }
  0x28   : > { %s1787_s20 = scalar_select %p281_p2, %s1625_s0, %s283_s18  }
  0x29   : > { %375 = sbr.rel (%p372_p1) target bundleno = 629 (0x275), region = 60  ;;  %s1793_s29 = sshll.u32 (!%p372_p1), %s2318_s21, 3 }
  0x2a   : > { %2340 = sst [smem:[#allocation20_spill]] %s1787_s20  ;;  %p429_p4 = scmp.lt.s32.totalorder (!%p372_p1), %s1629_s24, 1 }
  0x2b   : > { %s426_s26 = scalar_lea.vmem (!%p372_p1), [#allocation5], %s1793_s29  ;;  %p1357_p5 = scmp.ne.s32.totalorder (!%p372_p1), %s1629_s24, 0 }
  0x30   : > { %s428_s30 = scalar_select %p427_p3, %s1633_s25, 1 }
  0x31   : > { %s430_s14 = scalar_select %p429_p4, %s1629_s24, 1 }
  0x32   : > { %s1351_s17 = sshll.u32 %s428_s30, 2  ;;  %s1405_s19 = smul.u32 104, %s428_s30  ;;  %v469_v0 = vlaneseq (!%p1357_p5)  ;;  %v467_v2 = vld [vmem:[%s2306_s7] sm:$0x7] (!%p1357_p5)  ;;  %vm531_vm0 = vcmask (!%p1357_p5), 1046528   ;;  %vm690_vm1 = vcmask (!%p1357_p5), 1045504  }
  0x33   : > { %s1350_s18 = sshll.u32 %s430_s14, 1  ;;  %s1354_s13 = sshll.u32 %s430_s14, 2  ;;  %v468_v3 = vld [vmem:[%s2308_s9] sm:$0x7] (!%p1357_p5)  ;;  %vm917_vm2 = vcmask (!%p1357_p5), 64512   ;;  %vm978_vm3 = vcmask (!%p1357_p5), 130112  }
  0x34   : > { %s433_s12 = sadd.s32 %s1351_s17, %s1350_s18  ;;  %s1801_s20 = scalar_lea.vmem %s2301_s2, %s1405_s19  ;;  %v470_v1 = vshrl.u32 (!%p1357_p5), %v469_v0, 7  ;;  %v1897_v46 = vld [vmem:[%s2309_s10] ss:$0 sm:$0xff] (!%p1357_p5) }
  0x35   : > { %s1352_s0 = sshll.u32 %s433_s12, 3  ;;  %s1806_s21 = scalar_lea.vmem %s2302_s3, %s1354_s13  ;;  %v456_v7 = vld [vmem:[%s1801_s20 + $0x10] sm:$0xff] (!%p1357_p5)  ;;  %v1828_v8 = vld [vmem:[%s1801_s20 + $0x18] sm:$0xff] (!%p1357_p5)  ;;  %v454_v27 = vld [vmem:[%s1801_s20] sm:$0xff] (!%p1357_p5) }
  0x36   : > { %s1811_s15 = scalar_lea.vmem %s2300_s1, %s1352_s0  ;;  %s1370_s30 = sshll.u32 %s430_s14, 4  ;;  %v471_v4 = vsub.s32 (!%p1357_p5), 0, %v470_v1  ;;  %v503_v5 = vsub.s32 (!%p1357_p5), 1, %v470_v1  ;;  %v662_v6 = vsub.s32 (!%p1357_p5), 2, %v470_v1  ;;  %v1867_v28 = vld [vmem:[%s1801_s20 + $0x8] sm:$0xff] (!%p1357_p5)  ;;  %v1892_v45 = vld [vmem:[%s1801_s20 + $0x20] sm:$0xff] (!%p1357_p5) }
  0x37   : > { %s1816_s17 = scalar_lea.vmem %s2303_s4, %s1370_s30  ;;  %453 = sbr.rel (%p1357_p5) target bundleno = 217 (0xd9), region = 64 }
  0x38   : > { %v1830_v9 = vrot.slane (!%p1357_p5), %v468_v3, %v471_v4  ;;  %v1832_v10 = vrot.slane (!%p1357_p5), %v467_v2, %v503_v5  ;;  %v1834_v11 = vrot.slane (!%p1357_p5), %v468_v3, %v503_v5  ;;  %v1836_v12 = vrot.slane (!%p1357_p5), %v467_v2, %v471_v4  ;;  %v1925_v4 = vld [vmem:[%s1801_s20 + $0x30] sm:$0xff] (!%p1357_p5)  ;;  %s1648_s28 = smov (!%p1357_p5), 8  }
  0x39   : > { %v1838_v13 = vrot.slane (!%p1357_p5), %v467_v2, %v662_v6  ;;  %v1840_v14 = vrot.slane (!%p1357_p5), %v468_v3, %v662_v6  ;;  %v1922_v3 = vld [vmem:[%s1801_s20 + $0x28] sm:$0xff] (!%p1357_p5) }
  0x3a   : > { %v491_v15 = vmul.f32 (!%p1357_p5), %v1830_v9, %v456_v7  ;;  %v1844_v16 = vmul.f32 (!%p1357_p5), %v1832_v10, %v456_v7  ;;  %v1848_v17 = vmul.f32 (!%p1357_p5), %v1832_v10, %v1828_v8  ;;  %v587_v18 = vmul.f32 (!%p1357_p5), %v1834_v11, %v456_v7 }
  0x3b   : > { %v588_v19 = vmul.f32 (!%p1357_p5), %v1834_v11, %v1828_v8  ;;  %v1854_v20 = vmul.f32 (!%p1357_p5), %v1838_v13, %v456_v7  ;;  %v1858_v21 = vmul.f32 (!%p1357_p5), %v1838_v13, %v1828_v8  ;;  %v746_v22 = vmul.f32 (!%p1357_p5), %v1840_v14, %v456_v7 }
  0x3c   : > { %v535_v23 = vrot.slane (!%p1357_p5), %v1844_v16, 1  ;;  %v537_v24 = vrot.slane (!%p1357_p5), %v1848_v17, 1  ;;  %v614_v25 = vrot.slane (!%p1357_p5), %v587_v18, 1  ;;  %v747_v26 = vmul.f32 (!%p1357_p5), %v1840_v14, %v1828_v8 }
  0x3d   : > { %v616_v29 = vrot.slane (!%p1357_p5), %v588_v19, 1  ;;  %v694_v30 = vrot.slane (!%p1357_p5), %v1854_v20, 2  ;;  %v773_v31 = vrot.slane (!%p1357_p5), %v746_v22, 2  ;;  %v1871_v32 = vmul.f32 (!%p1357_p5), %v1836_v12, %v456_v7 }
  0x3e   : > { %v775_v33 = vrot.slane %v747_v26, 2  ;;  %v489_v34 = vmul.f32 %v1830_v9, %v454_v27  ;;  %v1875_v35 = vmul.f32 %v1832_v10, %v454_v27  ;;  %v1879_v36 = vmul.f32 %v1832_v10, %v1867_v28 }
  0x3f   : > { %v617_v37 = vsel %vm531_vm0, %v614_v25, %v616_v29  ;;  %v585_v38 = vmul.f32 %v1834_v11, %v454_v27  ;;  %v586_v39 = vmul.f32 %v1834_v11, %v1867_v28  ;;  %v1886_v40 = vmul.f32 %v1838_v13, %v454_v27 }
  0x40   : > { %v650_v41 = vadd.f32 %v617_v37, %v491_v15  ;;  %v776_v42 = vsel %vm690_vm1, %v773_v31, %v775_v33  ;;  %v532_v43 = vrot.slane %v1875_v35, 1  ;;  %v533_v44 = vrot.slane %v1879_v36, 1 }
  0x41   : > { %v611_v47 = vrot.slane %v585_v38, 1  ;;  %v612_v48 = vrot.slane %v586_v39, 1  ;;  %v1901_v49 = vmul.f32 %v1838_v13, %v1867_v28  ;;  %v691_v50 = vrot.slane %v1886_v40, 2 }
  0x42   : > { %v809_v51 = vadd.f32 %v776_v42, %v650_v41  ;;  %v744_v52 = vmul.f32 %v1840_v14, %v454_v27  ;;  %v745_v53 = vmul.f32 %v1840_v14, %v1867_v28  ;;  %v1908_v54 = vmul.f32 %v1836_v12, %v454_v27 }
  0x43   : > { %v613_v55 = vsel %vm531_vm0, %v611_v47, %v612_v48  ;;  %v492_v56 = vmul.f32 %v1830_v9, %v1828_v8  ;;  %v589_v57 = vmul.f32 %v1834_v11, %v1892_v45  ;;  %v748_v58 = vmul.f32 %v1840_v14, %v1892_v45 }
  0x44   : > { %v907_v59 = vadd.f32 %v1897_v46, %v809_v51  ;;  %v648_v60 = vadd.f32 %v613_v55, %v489_v34  ;;  %v770_v61 = vrot.slane %v744_v52, 2  ;;  %v771_v62 = vrot.slane %v745_v53, 2  ;;  %v1956_v55 = vld [vmem:[%s1801_s20 + $0x40] sm:$0xff] }
  0x45   : > { %v618_v63 = vrot.slane %v589_v57, 1  ;;  %v777_v0 = vrot.slane %v748_v58, 2  ;;  %v490_v1 = vmul.f32 %v1830_v9, %v1867_v28  ;;  %v615_v2 = vsel %vm531_vm0, %v612_v48, %v614_v25  ;;  %v1951_v48 = vld [vmem:[%s1801_s20 + $0x38] sm:$0xff] }
  0x46   : > { %946 = vrot.lane.b32.xlu1 %v907_v59, %s1648_s28  ;;  %v772_v5 = vsel %vm690_vm1, %v770_v61, %v771_v62  ;;  %v774_v6 = vsel %vm690_vm1, %v771_v62, %v773_v31  ;;  %v494_v7 = vmul.f32 %v1830_v9, %v1922_v3  ;;  %v1934_v15 = vmul.f32 %v1832_v10, %v1922_v3 }
  0x47   : > { %v807_v18 = vadd.f32 %v772_v5, %v648_v60  ;;  %v619_v19 = vsel %vm531_vm0, %v616_v29, %v618_v63  ;;  %v778_v22 = vsel %vm690_vm1, %v775_v33, %v777_v0  ;;  %v649_v25 = vadd.f32 %v615_v2, %v490_v1 }
  0x48   : > { %v651_v26 = vadd.f32 %v619_v19, %v492_v56  ;;  %v541_v27 = vrot.slane %v1934_v15, 1  ;;  %v590_v31 = vmul.f32 %v1834_v11, %v1922_v3  ;;  %v591_v34 = vmul.f32 %v1834_v11, %v1925_v4 }
  0x49   : > { %v905_v37 = vadd.f32 %v1897_v46, %v807_v18  ;;  %v808_v38 = vadd.f32 %v774_v6, %v649_v25  ;;  %v749_v39 = vmul.f32 %v1840_v14, %v1922_v3  ;;  %v750_v29 = vmul.f32 %v1840_v14, %v1925_v4  ;;  %v1983_v25 = vld [vmem:[%s1801_s20 + $0x48] sm:$0xff] }
  0x4a   : > { %v810_v33 = vadd.f32 %v778_v22, %v651_v26  ;;  %v620_v41 = vrot.slane %v590_v31, 1  ;;  %v622_v42 = vrot.slane %v591_v34, 1  ;;  %v493_v47 = vmul.f32 %v1830_v9, %v1892_v45 }
  0x4b   : > { %942 = vrot.lane.b32.xlu0 %v905_v37, %s1648_s28  ;;  %v906_v51 = vadd.f32 %v1897_v46, %v808_v38  ;;  %v779_v52 = vrot.slane %v749_v39, 2  ;;  %v781_v53 = vrot.slane %v750_v29, 2  ;;  %v496_v56 = vmul.f32 %v1830_v9, %v1951_v48 }
  0x4c   : > { %v908_v57 = vadd.f32 %v1897_v46, %v810_v33  ;;  %v623_v58 = vsel %vm531_vm0, %v620_v41, %v622_v42  ;;  %v621_v59 = vsel %vm531_vm0, %v618_v63, %v620_v41  ;;  %v1965_v60 = vmul.f32 %v1832_v10, %v1951_v48  ;;  %v1990_v33 = vld [vmem:[%s1801_s20 + $0x50] sm:$0xff] }
  0x4d   : > { %v653_v61 = vadd.f32 %v623_v58, %v494_v7  ;;  %v782_v62 = vsel %vm690_vm1, %v779_v52, %v781_v53  ;;  %v652_v1 = vadd.f32 %v621_v59, %v493_v47  ;;  %v780_v2 = vsel %vm690_vm1, %v777_v0, %v779_v52 }
  0x4e   : > { %948 = vrot.lane.b32.xlu1 %v908_v57, %s1648_s28  ;;  %v545_v5 = vrot.slane %v1965_v60, 1  ;;  %v592_v6 = vmul.f32 %v1834_v11, %v1951_v48  ;;  %v593_v63 = vmul.f32 %v1834_v11, %v1956_v55  ;;  %v751_v18 = vmul.f32 %v1840_v14, %v1951_v48 }
  0x4f   : > { %944 = vrot.lane.b32.xlu0 %v906_v51, %s1648_s28  ;;  %v812_v7 = vadd.f32 %v782_v62, %v653_v61  ;;  %v811_v19 = vadd.f32 %v780_v2, %v652_v1  ;;  %v752_v0 = vmul.f32 %v1840_v14, %v1956_v55  ;;  %v495_v22 = vmul.f32 %v1830_v9, %v1925_v4 }
  0x50   : > { %v624_v26 = vrot.slane %v592_v6, 1  ;;  %v626_v31 = vrot.slane %v593_v63, 1  ;;  %v783_v34 = vrot.slane %v751_v18, 2  ;;  %v498_v37 = vmul.f32 %v1830_v9, %v1983_v25  ;;  %v2012_v6 = vld [vmem:[%s1801_s20 + $0x58] sm:$0xff] }
  0x51   : > { %v910_v38 = vadd.f32 %v1897_v46, %v812_v7  ;;  %v909_v39 = vadd.f32 %v1897_v46, %v811_v19  ;;  %v785_v29 = vrot.slane %v752_v0, 2  ;;  %v1994_v41 = vmul.f32 %v1832_v10, %v1983_v25 }
  0x52   : > { %v627_v47 = vsel %vm531_vm0, %v624_v26, %v626_v31  ;;  %v625_v51 = vsel %vm531_vm0, %v622_v42, %v624_v26  ;;  %v784_v52 = vsel %vm690_vm1, %v781_v53, %v783_v34  ;;  %v594_v57 = vmul.f32 %v1834_v11, %v1983_v25 }
  0x53   : > { %952 = vrot.lane.b32.xlu1 %v910_v38, %s1648_s28  ;;  %950 = vrot.lane.b32.xlu0 %v909_v39, %s1648_s28  ;;  %v655_v58 = vadd.f32 %v627_v47, %v496_v56  ;;  %v786_v59 = vsel %vm690_vm1, %v783_v34, %v785_v29  ;;  %v654_v61 = vadd.f32 %v625_v51, %v495_v22  ;;  %v549_v62 = vrot.slane %v1994_v41, 1  ;;  %v466_v47 = vld [vmem:[%s1801_s20 + $0x60] sm:$0x3] }
  0x54   : > { %v595_v1 = vmul.f32 %v1834_v11, %v1990_v33  ;;  %v628_v42 = vrot.slane %v594_v57, 1  ;;  %v753_v53 = vmul.f32 %v1840_v14, %v1983_v25  ;;  %v754_v2 = vmul.f32 %v1840_v14, %v1990_v33 }
  0x55   : > { %v814_v63 = vadd.f32 %v786_v59, %v655_v58  ;;  %v813_v56 = vadd.f32 %v784_v52, %v654_v61  ;;  %v497_v18 = vmul.f32 %v1830_v9, %v1956_v55  ;;  %v500_v7 = vmul.f32 %v1830_v9, %v2012_v6 }
  0x56   : > { %v630_v19 = vrot.slane %v595_v1, 1  ;;  %v787_v0 = vrot.slane %v753_v53, 2  ;;  %v789_v22 = vrot.slane %v754_v2, 2  ;;  %v629_v26 = vsel %vm531_vm0, %v626_v31, %v628_v42 }
  0x57   : > { %v912_v34 = vadd.f32 %v1897_v46, %v814_v63  ;;  %v911_v38 = vadd.f32 %v1897_v46, %v813_v56  ;;  %v656_v39 = vadd.f32 %v629_v26, %v497_v18  ;;  %v2024_v51 = vmul.f32 %v1832_v10, %v2012_v6 }
  0x58   : > { %v631_v52 = vsel %vm531_vm0, %v628_v42, %v630_v19  ;;  %v790_v57 = vsel %vm690_vm1, %v787_v0, %v789_v22  ;;  %v788_v58 = vsel %vm690_vm1, %v785_v29, %v787_v0  ;;  %v2030_v59 = vmul.f32 %v1832_v10, %v466_v47 }
  0x59   : > { %956 = vrot.lane.b32.xlu1 %v912_v34, %s1648_s28  ;;  %954 = vrot.lane.b32.xlu0 %v911_v38, %s1648_s28  ;;  %v657_v31 = vadd.f32 %v631_v52, %v498_v37  ;;  %v815_v61 = vadd.f32 %v788_v58, %v656_v39  ;;  %v553_v1 = vrot.slane %v2024_v51, 1  ;;  %v596_v53 = vmul.f32 %v1834_v11, %v2012_v6 }
  0x5a   : > { %v555_v42 = vrot.slane %v2030_v59, 1  ;;  %v597_v2 = vmul.f32 %v1834_v11, %v466_v47  ;;  %v2040_v29 = vmul.f32 %v1838_v13, %v466_v47  ;;  %v755_v63 = vmul.f32 %v1840_v14, %v2012_v6 }
  0x5b   : > { %v816_v56 = vadd.f32 %v790_v57, %v657_v31  ;;  %v913_v18 = vadd.f32 %v1897_v46, %v815_v61  ;;  %v632_v37 = vrot.slane %v596_v53, 1  ;;  %v756_v0 = vmul.f32 %v1840_v14, %v466_v47 }
  0x5c   : > { %v634_v26 = vrot.slane %v597_v2, 1  ;;  %v714_v34 = vrot.slane %v2040_v29, 2  ;;  %v791_v38 = vrot.slane %v755_v63, 2  ;;  %v499_v39 = vmul.f32 %v1830_v9, %v1990_v33 }
  0x5d   : > { %v914_v11 = vadd.f32 %v1897_v46, %v816_v56  ;;  %958 = vrot.lane.b32.xlu0 %v913_v18, %s1648_s28  ;;  %v793_v52 = vrot.slane %v756_v0, 2  ;;  %v633_v58 = vsel %vm531_vm0, %v630_v19, %v632_v37  ;;  %v538_v14 = vsel %vm531_vm0, %v535_v23, %v537_v24 }
  0x5e   : > { %v635_v47 = vsel %vm531_vm0, %v632_v37, %v634_v26  ;;  %v658_v57 = vadd.f32 %v633_v58, %v499_v39  ;;  %v792_v31 = vsel %vm690_vm1, %v789_v22, %v791_v38  ;;  %v696_v9 = vrot.slane %v1858_v21, 2  ;;  %v2074_v21 = vld [vmem:[%s2307_s8] ss:$0 sm:$0xff] }
  0x5f   : > { %960 = vrot.lane.b32.xlu1 %v914_v11, %s1648_s28  ;;  %v659_v61 = vadd.f32 %v635_v47, %v500_v7  ;;  %v794_v53 = vsel %vm690_vm1, %v791_v38, %v793_v52  ;;  %v571_v19 = vadd.f32 %v538_v14, %v1871_v32  ;;  %v534_v2 = vsel %vm531_vm0, %v532_v43, %v533_v44 }
  0x60   : > { %v817_v63 = vadd.f32 %v792_v31, %v658_v57  ;;  %v697_v22 = vsel %vm690_vm1, %v694_v30, %v696_v9  ;;  %v692_v7 = vrot.slane %v1901_v49, 2  ;;  %v569_v32 = vadd.f32 %v534_v2, %v1908_v54 }
  0x61   : > { %v818_v56 = vadd.f32 %v794_v53, %v659_v61  ;;  %v730_v18 = vadd.f32 %v697_v22, %v571_v19  ;;  %v476_v35 = vmul.f32 %v1836_v12, %v1828_v8  ;;  %v509_v43 = vmul.f32 %v1832_v10, %v1892_v45 }
  0x62   : > { %v915_v37 = vadd.f32 %v1897_v46, %v817_v63  ;;  %v693_v0 = vsel %vm690_vm1, %v691_v50, %v692_v7  ;;  %v668_v26 = vmul.f32 %v1838_v13, %v1892_v45  ;;  %v474_v49 = vmul.f32 %v1836_v12, %v1867_v28 }
  0x63   : > { %v916_v54 = vadd.f32 %v1897_v46, %v818_v56  ;;  %v828_v38 = vadd.f32 %v2074_v21, %v730_v18  ;;  %v728_v8 = vadd.f32 %v693_v0, %v569_v32  ;;  %v539_v39 = vrot.slane %v509_v43, 1 }
  0x64   : > { %962 = vrot.lane.b32.xlu0 %v915_v37, %s1648_s28  ;;  %v698_v11 = vrot.slane %v668_v26, 2  ;;  %v536_v40 = vsel %vm531_vm0, %v533_v44, %v535_v23  ;;  %v695_v50 = vsel %vm690_vm1, %v692_v7, %v694_v30  ;;  %v478_v28 = vmul.f32 %v1836_v12, %v1922_v3 }
  0x65   : > { %964 = vrot.lane.b32.xlu1 %v916_v54, %s1648_s28  ;;  %v840_v46 = vsub.f32 0.0, %v828_v38  ;;  %v826_v52 = vadd.f32 %v2074_v21, %v728_v8  ;;  %v540_v16 = vsel %vm531_vm0, %v537_v24, %v539_v39  ;;  %v570_v58 = vadd.f32 %v536_v40, %v474_v49 }
  0x66   : > { %v572_v36 = vadd.f32 %v540_v16, %v476_v35  ;;  %v699_v23 = vsel %vm690_vm1, %v696_v9, %v698_v11  ;;  %v511_v20 = vmul.f32 %v1832_v10, %v1925_v4  ;;  %v669_v30 = vmul.f32 %v1838_v13, %v1922_v3 }
  0x67   : > { %v854_v44 = vmul.f32 1.442695, %v840_v46  ;;  %v838_v14 = vsub.f32 0.0, %v826_v52  ;;  %v729_v47 = vadd.f32 %v695_v50, %v570_v58  ;;  %v670_v57 = vmul.f32 %v1838_v13, %v1925_v4 }
  0x68   : > { %v731_v31 = vadd.f32 %v699_v23, %v572_v36  ;;  %v543_v17 = vrot.slane %v511_v20, 1  ;;  %v700_v61 = vrot.slane %v669_v30, 2  ;;  %v477_v24 = vmul.f32 %v1836_v12, %v1892_v45 }
  0x69   : > { %1485 = vpow2.f32 %v854_v44  ;;  %v850_v9 = vmul.f32 1.442695, %v838_v14  ;;  %v827_v53 = vadd.f32 %v2074_v21, %v729_v47  ;;  %v702_v19 = vrot.slane %v670_v57, 2 }
  0x6a   : > { %v829_v2 = vadd.f32 %v2074_v21, %v731_v31  ;;  %v544_v3 = vsel %vm531_vm0, %v541_v27, %v543_v17  ;;  %v542_v63 = vsel %vm531_vm0, %v539_v39, %v541_v27  ;;  %v701_v22 = vsel %vm690_vm1, %v698_v11, %v700_v61 }
  0x6b   : > { %1487 = vpow2.f32 %v850_v9  ;;  %v839_v7 = vsub.f32 0.0, %v827_v53  ;;  %v574_v45 = vadd.f32 %v544_v3, %v478_v28  ;;  %v703_v32 = vsel %vm690_vm1, %v700_v61, %v702_v19 }
  0x6c   : > { %v841_v56 = vsub.f32 0.0, %v829_v2  ;;  %v573_v18 = vadd.f32 %v542_v63, %v477_v24  ;;  %v480_v35 = vmul.f32 %v1836_v12, %v1951_v48  ;;  %v513_v43 = vmul.f32 %v1832_v10, %v1956_v55 }
  0x6d   : > { %v852_v37 = vmul.f32 1.442695, %v839_v7  ;;  %v733_v0 = vadd.f32 %v703_v32, %v574_v45  ;;  %v671_v15 = vmul.f32 %v1838_v13, %v1951_v48  ;;  %v672_v27 = vmul.f32 %v1838_v13, %v1956_v55 }
  0x6e   : > { %v856_v26 = vmul.f32 1.442695, %v841_v56  ;;  %v732_v49 = vadd.f32 %v701_v22, %v573_v18  ;;  %v547_v54 = vrot.slane %v513_v43, 1  ;;  %v479_v38 = vmul.f32 %v1836_v12, %v1925_v4 }
  0x6f   : > { %1489 = vpow2.f32 %v852_v37  ;;  %v831_v8 = vadd.f32 %v2074_v21, %v733_v0  ;;  %v704_v39 = vrot.slane %v671_v15, 2  ;;  %v706_v11 = vrot.slane %v672_v27, 2 }
  0x70   : > { %1491 = vpow2.f32 %v856_v26  ;;  %v830_v40 = vadd.f32 %v2074_v21, %v732_v49  ;;  %v548_v48 = vsel %vm531_vm0, %v545_v5, %v547_v54  ;;  %v546_v50 = vsel %vm531_vm0, %v543_v17, %v545_v5 }
  0x71   : > { %v843_v28 = vsub.f32 0.0, %v831_v8  ;;  %v576_v46 = vadd.f32 %v548_v48, %v480_v35  ;;  %v707_v4 = vsel %vm690_vm1, %v704_v39, %v706_v11  ;;  %v575_v52 = vadd.f32 %v546_v50, %v479_v38 }
  0x72   : > { %v842_v16 = vsub.f32 0.0, %v830_v40  ;;  %v705_v58 = vsel %vm690_vm1, %v702_v19, %v704_v39  ;;  %v482_v36 = vmul.f32 %v1836_v12, %v1983_v25  ;;  %v515_v23 = vmul.f32 %v1832_v10, %v1990_v33 }
  0x73   : > { %v1486_v20 = vpop.eup %1485  ;;  %v860_v30 = vmul.f32 1.442695, %v843_v28  ;;  %v735_v44 = vadd.f32 %v707_v4, %v576_v46  ;;  %v734_v60 = vadd.f32 %v705_v58, %v575_v52  ;;  %v673_v5 = vmul.f32 %v1838_v13, %v1983_v25 }
  0x74   : > { %v876_v14 = vadd.f32 1.0, %v1486_v20  ;;  %v858_v47 = vmul.f32 1.442695, %v842_v16  ;;  %v551_v57 = vrot.slane %v515_v23, 1  ;;  %v674_v31 = vmul.f32 %v1838_v13, %v1990_v33 }
  0x75   : > { %v1488_v17 = vpop.eup %1487  ;;  %1493 = vpow2.f32 %v860_v30  ;;  %v833_v61 = vadd.f32 %v2074_v21, %v735_v44  ;;  %v832_v24 = vadd.f32 %v2074_v21, %v734_v60  ;;  %v708_v10 = vrot.slane %v673_v5, 2 }
  0x76   : > { %1495 = vrcp.f32 %v876_v14  ;;  %v874_v9 = vadd.f32 1.0, %v1488_v17  ;;  %v552_v53 = vsel %vm531_vm0, %v549_v62, %v551_v57  ;;  %v710_v25 = vrot.slane %v674_v31, 2 }
  0x77   : > { %1497 = vpow2.f32 %v858_v47  ;;  %v845_v19 = vsub.f32 0.0, %v833_v61  ;;  %v844_v2 = vsub.f32 0.0, %v832_v24  ;;  %v578_v3 = vadd.f32 %v552_v53, %v482_v36 }
  0x78   : > { %1499 = vrcp.f32 %v874_v9  ;;  %v711_v63 = vsel %vm690_vm1, %v708_v10, %v710_v25  ;;  %v481_v22 = vmul.f32 %v1836_v12, %v1956_v55  ;;  %v550_v7 = vsel %vm531_vm0, %v547_v54, %v549_v62 }
  0x79   : > { %v1490_v45 = vpop.eup %1489  ;;  %v864_v32 = vmul.f32 1.442695, %v845_v19  ;;  %v862_v56 = vmul.f32 1.442695, %v844_v2  ;;  %v737_v18 = vadd.f32 %v711_v63, %v578_v3  ;;  %v709_v35 = vsel %vm690_vm1, %v706_v11, %v708_v10 }
  0x7a   : > { %v1492_v43 = vpop.eup %1491  ;;  %v875_v37 = vadd.f32 1.0, %v1490_v45  ;;  %v577_v0 = vadd.f32 %v550_v7, %v481_v22  ;;  %v484_v15 = vmul.f32 %v1836_v12, %v2012_v6  ;;  %v556_v55 = vsel %vm531_vm0, %v553_v1, %v555_v42 }
  0x7b   : > { %v877_v41 = vadd.f32 1.0, %v1492_v43  ;;  %1501 = vpow2.f32 %v864_v32  ;;  %v835_v62 = vadd.f32 %v2074_v21, %v737_v18  ;;  %v675_v27 = vmul.f32 %v1838_v13, %v2012_v6 }
  0x7c   : > { %1503 = vrcp.f32 %v875_v37  ;;  %v736_v26 = vadd.f32 %v709_v35, %v577_v0  ;;  %v580_v49 = vadd.f32 %v556_v55, %v484_v15  ;;  %v483_v54 = vmul.f32 %v1836_v12, %v1990_v33 }
  0x7d   : > { %1505 = vrcp.f32 %v877_v41  ;;  %v847_v38 = vsub.f32 0.0, %v835_v62  ;;  %v712_v59 = vrot.slane %v675_v27, 2  ;;  %v554_v42 = vsel %vm531_vm0, %v551_v57, %v553_v1 }
  0x7e   : > { %1507 = vpow2.f32 %v862_v56  ;;  %v834_v8 = vadd.f32 %v2074_v21, %v736_v26  ;;  %v579_v39 = vadd.f32 %v554_v42, %v483_v54 }
  0x7f   : > { %v1494_v11 = vpop.eup %1493  ;;  %v868_v13 = vmul.f32 1.442695, %v847_v38  ;;  %v715_v6 = vsel %vm690_vm1, %v712_v59, %v714_v34  ;;  %v713_v12 = vsel %vm690_vm1, %v710_v25, %v712_v59 }
  0x80   : > { %v1496_v33 = vpop.eup %1495  ;;  %v879_v40 = vadd.f32 1.0, %v1494_v11  ;;  %v846_v48 = vsub.f32 0.0, %v834_v8  ;;  %v739_v50 = vadd.f32 %v715_v6, %v580_v49  ;;  %v738_v51 = vadd.f32 %v713_v12, %v579_v39 }
  0x81   : > { %v1498_v28 = vpop.eup %1497  ;;  %920 = vst.msk [vmem:[#allocation2 + $0x10] sm:$0xff] %vm917_vm2, %v1496_v33  ;;  %1509 = vpow2.f32 %v868_v13 }
  0x82   : > { %v1500_v1 = vpop.eup %1499  ;;  %1511 = vrcp.f32 %v879_v40  ;;  %v878_v46 = vadd.f32 1.0, %v1498_v28  ;;  %v866_v4 = vmul.f32 1.442695, %v846_v48  ;;  %v837_v52 = vadd.f32 %v2074_v21, %v739_v50 }
  0x83   : > { %918 = vst.msk [vmem:[#allocation2] sm:$0xff] %vm917_vm2, %v1500_v1  ;;  %v836_v29 = vadd.f32 %v2074_v21, %v738_v51 }
  0x84   : > { %1513 = vrcp.f32 %v878_v46  ;;  %v849_v34 = vsub.f32 0.0, %v837_v52 }
  0x85   : > { %v1502_v16 = vpop.eup %1501  ;;  %1515 = vpow2.f32 %v866_v4  ;;  %v848_v58 = vsub.f32 0.0, %v836_v29 }
  0x86   : > { %v1504_v36 = vpop.eup %1503  ;;  %v881_v23 = vadd.f32 1.0, %v1502_v16  ;;  %v872_v20 = vmul.f32 1.442695, %v849_v34 }
  0x87   : > { %v1506_v30 = vpop.eup %1505  ;;  %919 = vst.msk [vmem:[#allocation2 + $0x8] sm:$0xff] %vm917_vm2, %v1504_v36  ;;  %v870_v44 = vmul.f32 1.442695, %v848_v58 }
  0x88   : > { %v1508_v60 = vpop.eup %1507  ;;  %921 = vst.msk [vmem:[#allocation2 + $0x18] sm:$0xff] %vm917_vm2, %v1506_v30  ;;  %1517 = vrcp.f32 %v881_v23 }
  0x89   : > { %v880_v5 = vadd.f32 1.0, %v1508_v60  ;;  %1519 = vpow2.f32 %v872_v20 }
  0x8a   : > { %1521 = vpow2.f32 %v870_v44 }
  0x8b   : > { %v1510_v21 = vpop.eup %1509  ;;  %1523 = vrcp.f32 %v880_v5 }
  0x8c   : > { %v1512_v14 = vpop.eup %1511  ;;  %v883_v47 = vadd.f32 1.0, %v1510_v21 }
  0x8d   : > { %923 = vst.msk [vmem:[#allocation2 + $0x28] sm:$0xff] %vm917_vm2, %v1512_v14 }
  0x8e   : > { %v1514_v57 = vpop.eup %1513  ;;  %1525 = vrcp.f32 %v883_v47 }
  0x8f   : > { %v1516_v31 = vpop.eup %1515  ;;  %922 = vst.msk [vmem:[#allocation2 + $0x20] sm:$0xff] %vm917_vm2, %v1514_v57 }
  0x90   : > { %v882_v17 = vadd.f32 1.0, %v1516_v31 }
  0x92   : > { %v1518_v61 = vpop.eup %1517  ;;  %1527 = vrcp.f32 %v882_v17 }
  0x93   : > { %v1520_v24 = vpop.eup %1519  ;;  %925 = vst.msk [vmem:[#allocation2 + $0x38] sm:$0xff] %vm917_vm2, %v1518_v61 }
  0x94   : > { %v1522_v10 = vpop.eup %1521  ;;  %v885_v9 = vadd.f32 1.0, %v1520_v24 }
  0x95   : > { %v1524_v53 = vpop.eup %1523  ;;  %v884_v25 = vadd.f32 1.0, %v1522_v10 }
  0x96   : > { %924 = vst.msk [vmem:[#allocation2 + $0x30] sm:$0xff] %vm917_vm2, %v1524_v53  ;;  %1529 = vrcp.f32 %v885_v9 }
  0x97   : > { %1531 = vrcp.f32 %v884_v25 }
  0x98   : > { %v1526_v19 = vpop.eup %1525 }
  0x99   : > { %927 = vst.msk [vmem:[#allocation2 + $0x48] sm:$0xff] %vm917_vm2, %v1526_v19 }
  0x9c   : > { %v1528_v2 = vpop.eup %1527 }
  0x9d   : > { %926 = vst.msk [vmem:[#allocation2 + $0x40] sm:$0xff] %vm917_vm2, %v1528_v2 }
  0xa0   : > { %v1530_v3 = vpop.eup %1529 }
  0xa1   : > { %v1532_v63 = vpop.eup %1531  ;;  %929 = vst.msk [vmem:[#allocation2 + $0x58] sm:$0xff] %vm917_vm2, %v1530_v3 }
  0xa2   : > { %928 = vst.msk [vmem:[#allocation2 + $0x50] sm:$0xff] %vm917_vm2, %v1532_v63 }
  0xb8   : > { %v947_v22 = vpop.permute.xlu1 %946 }
  0xb9   : > { %981 = vst.msk [vmem:[#allocation2 + $0x10] sm:$0xff] %vm978_vm3, %v947_v22 }
  0xbd   : > { %v943_v7 = vpop.permute.xlu0 %942 }
  0xbe   : > { %979 = vst.msk [vmem:[#allocation2] sm:$0xff] %vm978_vm3, %v943_v7 }
  0xc0   : > { %v949_v45 = vpop.permute.xlu1 %948 }
  0xc1   : > { %982 = vst.msk [vmem:[#allocation2 + $0x18] sm:$0xff] %vm978_vm3, %v949_v45  ;;  %v945_v32 = vpop.permute.xlu0 %944 }
  0xc2   : > { %980 = vst.msk [vmem:[#allocation2 + $0x8] sm:$0xff] %vm978_vm3, %v945_v32 }
  0xc5   : > { %v953_v56 = vpop.permute.xlu1 %952  ;;  %v951_v18 = vpop.permute.xlu0 %950 }
  0xc6   : > { %984 = vst.msk [vmem:[#allocation2 + $0x28] sm:$0xff] %vm978_vm3, %v953_v56  ;;  %983 = vst.msk [vmem:[#allocation2 + $0x20] sm:$0xff] %vm978_vm3, %v951_v18 }
  0xcb   : > { %v957_v35 = vpop.permute.xlu1 %956  ;;  %v955_v43 = vpop.permute.xlu0 %954 }
  0xcc   : > { %986 = vst.msk [vmem:[#allocation2 + $0x38] sm:$0xff] %vm978_vm3, %v957_v35  ;;  %985 = vst.msk [vmem:[#allocation2 + $0x30] sm:$0xff] %vm978_vm3, %v955_v43 }
  0xcf   : > { %v959_v37 = vpop.permute.xlu0 %958 }
  0xd0   : > { %987 = vst.msk [vmem:[#allocation2 + $0x40] sm:$0xff] %vm978_vm3, %v959_v37 }
  0xd1   : > { %v961_v0 = vpop.permute.xlu1 %960 }
  0xd2   : > { %988 = vst.msk [vmem:[#allocation2 + $0x48] sm:$0xff] %vm978_vm3, %v961_v0 }
  0xd6   : > { %v963_v15 = vpop.permute.xlu0 %962 }
  0xd7   : > { %v965_v55 = vpop.permute.xlu1 %964  ;;  %989 = vst.msk [vmem:[#allocation2 + $0x50] sm:$0xff] %vm978_vm3, %v963_v15 }
  0xd8   : > { %990 = vst.msk [vmem:[#allocation2 + $0x58] sm:$0xff] %vm978_vm3, %v965_v55 }
  0xd9 PF: > { %v993_v41 = vld [vmem:[%s2304_s5] sm:$0xff]  ;;  %s1079_s14 = sld [smem:[#allocation4 + %s1629_s24]]  ;;  %v1649_v62 = vmov 1   ;;  %v1650_v27 = vmov 2   ;;  %v1651_v54 = vmov 0   ;;  %v1379_v8 = vld [vmem:[%s1816_s17 + $0x8] sm:$0xff]  }
  0xda   : > { %1533 = vset.pattern.permute.xlu1 %v1649_v62  ;;  %v1037_v59 = vld [vmem:[%s2305_s6] sm:$0xff]  ;;  %v992_v13 = vld [vmem:[%s1811_s15 + $0x8] sm:$0xff]  ;;  %s1652_s22 = smov 127   ;;  %vm1125_vm4 = vcmask 261120   ;;  %vm1013_vm5 = vcmask 1039360   ;;  %vm1031_vm6 = vcmask 1031168  }
  0xdb   : > { %1002 = vperm.xlu1 %1533, %v993_v41   ;;  %v1372_v42 = vld [vmem:[%s1816_s17] sm:$0xff]   ;;  %s1653_s17 = smov 126   ;;  %s2342_s27 = sld [smem:[#allocation10_spill]] }
  0xdc   : > { %1398 = vmatprep.subr.bf16.mxu0 %v1372_v42  ;;  %v991_v11 = vld [vmem:[%s1811_s15] sm:$0xff]  ;;  %s2341_s15 = sld [smem:[#allocation12_spill]]  ;;  %s1226_s28 = sshll.u32 %s426_s26, 4  ;;  %s2244_s28 = int_to_ptr.vmem [resolvable:$true] %s1226_s28 }
  0xdd   : > { %1400 = vmatpush3.bf16.msra.mxu0 %v1372_v42  ;;  %v1360_v61 = vld [vmem:[%s1806_s21] ss:$0 sm:$0xff]  ;;  %v1361_v10 = vld [vmem:[%s1806_s21 + $0x1] ss:$0 sm:$0xff]  ;;  %v1362_v25 = vld [vmem:[%s1806_s21 + $0x2] ss:$0 sm:$0xff] }
  0xde   : > { %1402 = vmatprep.subr.bf16.mxu0 %v1379_v8  ;;  %s2344_s16 = sld [smem:[#allocation21_spill]] }
  0xdf   : > { %1534 = vset.pattern.permute.xlu1 %v1650_v27  ;;  %s1080_s19 = scalar_lea.vmem [#allocation2], %s1079_s14  ;;  %s1549_s14 = scalar_lea.vmem %s2244_s28, 128 }
  0xe0   : > { %1020 = vperm.xlu1 %1534, %v993_v41   ;;  %v1081_v26 = vld [vmem:[%s1080_s19] sm:$0xff]  ;;  %v1082_v49 = vld [vmem:[%s1080_s19 + $0x8] sm:$0xff]  ;;  %v1083_v38 = vld [vmem:[%s1080_s19 + $0x10] sm:$0xff]  ;;  %p1550_p6 = scmp.ne.s32.totalorder %s2244_s28, %s1549_s14 }
  0xe1   : > { %1093 = vxpose.xlu0.b32.start [1/4] (short) (narrow) %v1081_v26, 16  ;;  %v1084_v39 = vld [vmem:[%s1080_s19 + $0x18] sm:$0xff]  ;;  %1404 = vmatpush3.bf16.msra.mxu0 %v1379_v8  ;;  %s2345_s21 = sand.u32 1, %s2342_s27   ;;  %s1654_s19 = smov [#allocation5]  }
  0xe2   : > { %s1366_s11 = sshll.u32 %s2341_s15, 1  ;;  %p1551_p7 = pnand %p1550_p6, %p1769_p8 }
  0xe3   : > { %s1222_s23 = sadd.s32 %s1629_s24, %s1366_s11  ;;  %s1211_s24 = scalar_lea.sflag [#allocation6], %s2345_s21 }
  0xe4   : > { %1535 = vset.pattern.permute.xlu1 %v1651_v54  ;;  %s1367_s25 = sshll.u32 %s1222_s23, 7  ;;  %p1552_p9 = pneg %p1551_p7 }
  0xe5   : > { %1094 = vxpose.xlu0.b32.cont [2/4] (short) (narrow) %v1082_v49, 16  ;;  %996 = vperm.xlu1 %1535, %v993_v41   ;;  %s2242_s20 = scalar_lea.hbm %s2344_s16, %s1367_s25  ;;  %s1553_s18 = sshll.u32 %s1654_s19, 4  ;;  %s1554_s18 = int_to_ptr.vmem [resolvable:$false] %s1553_s18 }
  0xe6   : > { %s1555_s30 = scalar_lea.vmem %s1554_s18, 256  ;;  %p1556_p10 = scmp.lt.s32.totalorder %s2244_s28, %s1554_s18 }
  0xe7   : > { %p1557_p11 = scmp.lt.s32.totalorder %s1555_s30, %s1549_s14 }
  0xe9   : > { %1095 = vxpose.xlu0.b32.cont [3/4] (short) (narrow) %v1083_v38, 16  ;;  %1040 = vperm.xlu1 %1535, %v1037_v59   ;;  %p1558_p12 = por %p1557_p11, %p1556_p10 }
  0xeb   : > { %p1559_p0 = pnand %p1558_p12, %p1552_p9 }
  0xed   : > { %1096 = vxpose.xlu0.b32.end [4/4] (short) (narrow) %v1084_v39, 16 }
 0x116   : > { %1536 = vset.pattern.permute.xlu0 %v1651_v54 }
 0x15a   : > { %v1003_v6 = vpop.permute.xlu1 %1002 }
 0x15b   : > { %v1005_v12 = vmul.f32 %v1003_v6, %v991_v11  ;;  %v1006_v33 = vmul.f32 %v1003_v6, %v992_v13 }
 0x15d   : > { %1011 = vrot.lane.b32.xlu1 %v1006_v33, %s1652_s22  ;;  %1009 = vrot.lane.b32.xlu0 %v1005_v12, %s1652_s22 }
 0x15f   : > { %v1021_v40 = vpop.permute.xlu1 %1020 }
 0x160   : > { %v1023_v48 = vmul.f32 %v1021_v40, %v991_v11  ;;  %v1024_v51 = vmul.f32 %v1021_v40, %v992_v13 }
 0x161   : > { %v1109_v50 = vpop.trf.xlu0 }
 0x162   : > { %1027 = vrot.lane.b32.xlu1 %v1023_v48, %s1653_s17  ;;  %1394 = vmatprep.mubr.msk.f32.mxu0 %vm1125_vm4, %v1109_v50 }
 0x164   : > { %v997_v1 = vpop.permute.xlu1 %996 }
 0x165   : > { %v1110_v28 = vpop.trf.xlu0  ;;  %v1000_v34 = vmul.f32 %v997_v1, %v992_v13  ;;  %v999_v58 = vmul.f32 %v997_v1, %v991_v11 }
 0x166   : > { %1029 = vrot.lane.b32.xlu1 %v1024_v51, %s1653_s17  ;;  %1395 = vmatmul.mubr.msk.f32.vlgmr.msra.gmra.mrb[0].mxu0 %vm1125_vm4, %v1110_v28 }
 0x168   : > { %v1041_v46 = vpop.permute.xlu1 %1040 }
 0x1cf   : > { %v1012_v4 = vpop.permute.xlu1 %1011  ;;  %v1010_v52 = vpop.permute.xlu0 %1009 }
 0x1d0   : > { %v1014_v16 = vsel %vm1013_vm5, %v1010_v52, %v1012_v4  ;;  %v1018_v36 = vadd.f32 %v1012_v4, %v1000_v34 }
 0x1d1   : > { %v1017_v20 = vadd.f32 %v1014_v16, %v999_v58 }
 0x1d4   : > { %v1028_v29 = vpop.permute.xlu1 %1027 }
 0x1d8   : > { %v1030_v23 = vpop.permute.xlu1 %1029 }
 0x1d9   : > { %v1032_v30 = vsel %vm1031_vm6, %v1028_v29, %v1030_v23  ;;  %v1036_v44 = vadd.f32 %v1030_v23, %v1018_v36 }
 0x1da   : > { %v1035_v60 = vadd.f32 %v1032_v30, %v1017_v20 }
 0x1db   : > { %v1044_v5 = vadd.f32 %v1041_v46, %v1036_v44 }
 0x1dc   : > { %v1043_v21 = vadd.f32 %v1041_v46, %v1035_v60 }
 0x1dd   : > { %1054 = vrot.lane.b32.xlu1 %v1044_v5, %s1653_s17 }
 0x1de   : > { %v1077_v63 = vmul.f32 %v1362_v25, %v1043_v21 }
 0x1e1   : > { %1052 = vrot.lane.b32.xlu1 %v1043_v21, %s1653_s17 }
 0x1e5   : > { %1064 = vrot.lane.b32.xlu1 %v1043_v21, %s1652_s22 }
 0x1e9   : > { %1066 = vrot.lane.b32.xlu1 %v1044_v5, %s1652_s22 }
 0x239   : > { %v1396_v14 = vpop.f32.mrb[0].mxu0 }
 0x23a   : > { %v1198_v47 = vpop.f32.mrb[1].mxu0 }
 0x24f   : > { %v1055_v57 = vpop.permute.xlu1 %1054 }
 0x253   : > { %v1053_v31 = vpop.permute.xlu1 %1052 }
 0x254   : > { %v1056_v24 = vsel %vm1031_vm6, %v1053_v31, %v1055_v57 }
 0x255   : > { %v1058_v19 = vmul.f32 %v1360_v61, %v1056_v24 }
 0x257   : > { %v1065_v17 = vpop.permute.xlu1 %1064 }
 0x25b   : > { %v1067_v9 = vpop.permute.xlu1 %1066 }
 0x25c   : > { %v1068_v53 = vsel %vm1013_vm5, %v1065_v17, %v1067_v9 }
 0x25d   : > { %v1070_v2 = vmul.f32 %v1361_v10, %v1068_v53 }
 0x25f   : > { %v1071_v3 = vadd.f32 %v1070_v2, %v1058_v19 }
 0x261   : > { %v1078_v22 = vadd.f32 %v1077_v63, %v1071_v3 }
 0x263   : > { %v1207_v7 = vmul.f32 %v1198_v47, %v1078_v22 }
 0x265   : > { %v1208_v45 = vadd.f32 %v1396_v14, %v1207_v7 }
 0x267   : > { %1209 = vst [vmem:[%s426_s26] sm:$0xff] %v1208_v45 }
 0x268   : > { %1562 = shalt.err (!%p1559_p0)
}
 0x269   : > { %s1563_s29 = scalar_lea.hbm %s2242_s20, 128  ;;  %s1567_s17 = scalar_lea.hbm %s2344_s16, 512 }
 0x26a   : > { %p1564_p1 = scmp.ne.s32.totalorder %s2242_s20, %s1563_s29  ;;  %p1568_p4 = scmp.lt.u32.totalorder %s2242_s20, %s2344_s16 }
 0x26b   : > { %p1569_p5 = scmp.lt.u32.totalorder %s1567_s17, %s1563_s29  ;;  %p1571_p7 = scmp.lt.u32.totalorder %s1563_s29, %s2242_s20 }
 0x26c   : > { %p1565_p2 = pnand %p1564_p1, %p1769_p8 }
 0x26d   : > { %p1570_p6 = por %p1569_p5, %p1568_p4 }
 0x26e   : > { %p1566_p3 = pneg %p1565_p2 }
 0x26f   : > { %p1572_p9 = por %p1571_p7, %p1570_p6 }
 0x271   : > { %p1573_p10 = pnand %p1572_p9, %p1566_p3 }
 0x273   : > { %1576 = shalt.err (!%p1573_p10)
}
 0x274   : > { %1406 = dma.vmem_to_hbm [thread:$0]  (%p1769_p8), %s2244_s28, 128, %s2242_s20, %s1211_s24  }
 0x275 PF: > { %s2346_s11 = sld [smem:[#allocation15_spill]]  ;;  %s2347_s23 = sld [smem:[#allocation9_spill]] }
 0x27b   : > { %p1412_p11 = scmp.ge.s32.totalorder %s2346_s11, 2  ;;  %s1238_s12 = sand.u32 1, %s2347_s23  }
 0x27c   : > { %s1239_s13 = scalar_lea.sflag [#allocation6], %s1238_s12 }
 0x27d   : > { %p1409_p12 = pnand %p1412_p11, %p1778_p13 }
 0x27f   : > { %1612 = dma.done.wait (!%p1409_p12), %s1239_s13, 128  }
 0x280   : > { %1614 = vsyncadd (!%p1409_p12), %s1239_s13, 4294967168  ;;  %s30_s28 = sadd.s32 1, %s2346_s11   ;;  %s2349_s22 = sld [smem:[#allocation10_spill]] }
 0x281   : > { %p27_p0 = scmp.ge.s32.totalorder %s30_s28, 6   ;;  %s2350_s23 = sld [smem:[#allocation11_spill]] }
 0x282   : > { %s2351_s0 = sld [smem:[#allocation20_spill]]  ;;  %s2352_s24 = sld [smem:[#allocation13_spill]] }
 0x283   : > { %s2353_s25 = sld [smem:[#allocation14_spill]]  ;;  %s2354_s26 = sld [smem:[#allocation16_spill]] }
 0x284   : > { %s2355_s27 = sld [smem:[#allocation18_spill]]  ;;  %29 = sbr.rel (!%p27_p0) target bundleno = 20 (0x14), region = 109 }
 0x28b   :  { %1244 = vsyncpa [#allocation6], 1 }
 0x28c   :  { %1246 = vsyncpa [#allocation6 + $0x1], 1 }

</bundles_post_ra>
